<compile_context>
chip_gen: v5e
topology: v5e:2x2
jax: 0.10.0
libtpu: 0.0.40
codegen_flags: <defaults>
</compile_context>

<pallas_src>
import functools

import jax
import jax.numpy as jnp
from jax.experimental import pallas as pl
from jax.experimental.pallas import tpu as pltpu


C_PAD = 128  # pad class dim to one full lane group -> unmasked output stores


def _sage_gnn_kernel(a_ref, x_ref, w1l_ref, w1r_ref, b1_ref, w2_ref, b2_ref, o_ref):
    """Fused SAGEConv -> tanh -> SAGEConv, single block (all N rows).

    a_ref   : [N, N]      pre-normalized adjacency  D^-1 * A  (A[dst, src] = multiplicity)
    x_ref   : [N, F]      node features
    w1l_ref : [F, H]      layer-1 lin_l weight (in x out)
    w1r_ref : [F, H]      layer-1 lin_r weight
    b1_ref  : [1, H]      layer-1 bias
    w2_ref  : [H, 2*CP]   [W2l_pad | W2r_pad], each padded to CP=128 output lanes
    b2_ref  : [1, CP]     layer-2 bias, padded
    o_ref   : [N, CP]     padded output (lane-dense store)
    """
    cp = o_ref.shape[1]

    a = a_ref[...]                                                        # [N, N]
    x = x_ref[...]                                                        # [N, F]

    # ---- layer 1 (reassociated): h1 = tanh( A_n (x W1l) + x W1r + b1 ) ----
    xp_l = jnp.dot(x, w1l_ref[...], preferred_element_type=jnp.float32)  # [N, H]
    xp_r = jnp.dot(x, w1r_ref[...], preferred_element_type=jnp.float32)  # [N, H]
    agg1 = jnp.dot(a, xp_l, preferred_element_type=jnp.float32)          # [N, H]
    h1 = jnp.tanh(agg1 + xp_r + b1_ref[...])                             # [N, H]

    # ---- layer 2 (reassociated): out = A_n (h1 W2l) + h1 W2r + b2 ----
    # single fused 256-lane projection; split on the 128-lane tile boundary
    p = jnp.dot(h1, w2_ref[...], preferred_element_type=jnp.float32)     # [N, 2*CP]
    p_l = p[:, :cp]                                                       # [N, CP]
    p_r = p[:, cp:]                                                       # [N, CP]
    agg2 = jnp.dot(a, p_l, preferred_element_type=jnp.float32)           # [N, CP]
    o_ref[...] = (agg2 + p_r + b2_ref[...]).astype(o_ref.dtype)          # lane-dense store


def build_adjacency(edge_index, n):
    """Dense, mean-normalized adjacency D^-1 * A with A[dst, src] = edge
    multiplicity (duplicates kept — matches PyG scatter-mean, which counts
    parallel edges in both numerator and degree).
    Static graph -> call ONCE and reuse across steps (hoisted glue)."""
    src, dst = edge_index[0], edge_index[1]
    adj = jnp.zeros((n, n), dtype=jnp.float32).at[dst, src].add(1.0)
    deg = jnp.sum(adj, axis=1, keepdims=True)
    return adj / jnp.maximum(deg, 1.0)


def pack_params(params, c_pad=C_PAD):
    """One-time packing (hoisted out of the per-step path): fuse layer-2
    lin_l/lin_r into a single [H, 2*c_pad] matmul operand, pad the class dim to
    c_pad lanes so the kernel's output store is unmasked."""
    w1l = params["w1l"]                                                   # [F, H]
    w1r = params["w1r"]                                                   # [F, H]
    b1 = params["b1"].reshape(1, -1)                                      # [1, H]
    c = params["w2l"].shape[1]
    pad = ((0, 0), (0, c_pad - c))
    w2 = jnp.concatenate(
        [jnp.pad(params["w2l"], pad), jnp.pad(params["w2r"], pad)], axis=1
    )                                                                     # [H, 2*c_pad]
    b2 = jnp.pad(params["b2"].reshape(1, -1), pad)                        # [1, c_pad]
    return w1l, w1r, b1, w2, b2


@functools.partial(jax.jit, static_argnames=("num_classes",))
def sparse_gnn_forward(x, adj_norm, packed, *, num_classes):
    """x: [N, F] features; adj_norm: [N, N] from build_adjacency;
    packed: tuple from pack_params (precomputed once)."""
    n, f = x.shape
    w1l, w1r, b1, w2, b2 = packed
    h = w1l.shape[1]

    out_pad = pl.pallas_call(
        _sage_gnn_kernel,
        out_shape=jax.ShapeDtypeStruct((n, C_PAD), jnp.float32),
        grid_spec=pltpu.PrefetchScalarGridSpec(
            num_scalar_prefetch=0,
            grid=(1,),                                       # single block: no redundant
            in_specs=[                                       # layer-1 recompute, no split
                pl.BlockSpec((n, n), lambda i: (0, 0)),          # D^-1 A (resident)
                pl.BlockSpec((n, f), lambda i: (0, 0)),          # x
                pl.BlockSpec((f, h), lambda i: (0, 0)),          # W1l
                pl.BlockSpec((f, h), lambda i: (0, 0)),          # W1r
                pl.BlockSpec((1, h), lambda i: (0, 0)),          # b1
                pl.BlockSpec((h, 2 * C_PAD), lambda i: (0, 0)),  # [W2l_pad | W2r_pad]
                pl.BlockSpec((1, C_PAD), lambda i: (0, 0)),      # b2_pad
            ],
            out_specs=pl.BlockSpec((n, C_PAD), lambda i: (0, 0)),
        ),
        compiler_params=pltpu.CompilerParams(
            dimension_semantics=("arbitrary",),
        ),
        cost_estimate=pl.CostEstimate(
            flops=2 * (n * f * h * 2 + n * n * h + n * h * 2 * C_PAD + n * n * C_PAD),
            transcendentals=n * h,
            bytes_accessed=4 * (n * n + n * f + 2 * f * h + h + h * 2 * C_PAD
                                + C_PAD + n * C_PAD),
        ),
    )(adj_norm, x, w1l, w1r, b1, w2, b2)

    return out_pad[:, :num_classes]   # strip the lane padding back to C classes


def _reference_forward(x, edge_index, params):
    """Pure-JAX reference of the same math (PyG-style scatter-mean, no dedupe)."""
    n = x.shape[0]
    adj = jnp.zeros((n, n), dtype=jnp.float32).at[edge_index[1], edge_index[0]].add(1.0)
    deg = adj.sum(axis=1, keepdims=True)
    a = adj / jnp.maximum(deg, 1.0)
    h1 = jnp.tanh(a @ x @ params["w1l"] + x @ params["w1r"] + params["b1"])
    return (a @ h1) @ params["w2l"] + h1 @ params["w2r"] + params["b2"]


if __name__ == "__main__":
    # Shapes implied by the module: node features = allfeatures[:, 1:9] -> 8 dims.
    N = 64            # number of segments / graph nodes
    INPUT_DIM = 8
    HIDDEN_DIM = 32
    OUTPUT_DIM = 5    # number of classes

    key = jax.random.PRNGKey(0)
    kx, ke, k1, k2, k3, k4, k5, k6 = jax.random.split(key, 8)

    # node features
    x = jax.random.normal(kx, (N, INPUT_DIM), dtype=jnp.float32)

    # deterministic sparse graph: a ring plus a few random chords (undirected)
    ring_src = jnp.arange(N, dtype=jnp.int32)
    ring_dst = (ring_src + 1) % N
    extra = jax.random.randint(ke, (2, 32), 0, N, dtype=jnp.int32)
    src = jnp.concatenate([ring_src, ring_dst, extra[0], extra[1]])
    dst = jnp.concatenate([ring_dst, ring_src, extra[1], extra[0]])
    edge_index = jnp.stack([src, dst])          # [2, E]

    # deterministic parameter init (SAGEConv: lin_l has bias, lin_r has no bias)
    def init(k, shape, fan_in):
        return (jax.random.uniform(k, shape, jnp.float32, -1.0, 1.0)
                / jnp.sqrt(jnp.float32(fan_in)))

    params = {
        "w1l": init(k1, (INPUT_DIM, HIDDEN_DIM), INPUT_DIM),   # lin_l weight^T
        "w1r": init(k2, (INPUT_DIM, HIDDEN_DIM), INPUT_DIM),   # lin_r weight^T
        "b1":  init(k3, (1, HIDDEN_DIM), INPUT_DIM),           # lin_l bias
        "w2l": init(k4, (HIDDEN_DIM, OUTPUT_DIM), HIDDEN_DIM),
        "w2r": init(k5, (HIDDEN_DIM, OUTPUT_DIM), HIDDEN_DIM),
        "b2":  init(k6, (1, OUTPUT_DIM), HIDDEN_DIM),
    }

    # Static graph / static params -> do ALL per-graph packing exactly once,
    # outside the per-step jitted path.
    adj_norm = build_adjacency(edge_index, N)
    packed = jax.tree_util.tree_map(jax.block_until_ready,
                                    pack_params(params, C_PAD))
    adj_norm = jax.block_until_ready(adj_norm)

    out = sparse_gnn_forward(x, adj_norm, packed, num_classes=OUTPUT_DIM)
    out = jax.block_until_ready(out)

    ref = _reference_forward(x, edge_index, params)
    assert out.shape == (N, OUTPUT_DIM)
    assert jnp.allclose(out, ref, atol=1e-4, rtol=1e-4), "mismatch vs JAX reference"

    print("KERNEL_OK")
</pallas_src>

<mosaic_0001>
module attributes {stable_mosaic.version = 11 : i64} {
  func.func @_sage_gnn_kernel(%arg0: i32, %arg1: memref<64x64xf32, #tpu.memory_space<vmem>>, %arg2: memref<64x8xf32, #tpu.memory_space<vmem>>, %arg3: memref<8x32xf32, #tpu.memory_space<vmem>>, %arg4: memref<8x32xf32, #tpu.memory_space<vmem>>, %arg5: memref<1x32xf32, #tpu.memory_space<vmem>>, %arg6: memref<32x256xf32, #tpu.memory_space<vmem>>, %arg7: memref<1x128xf32, #tpu.memory_space<vmem>>, %arg8: memref<64x128xf32, #tpu.memory_space<vmem>>) attributes {dimension_semantics = [#tpu.dimension_semantics<arbitrary>], iteration_bounds = array<i64: 1>, scalar_prefetch = 0 : i64, scratch_operands = 0 : i64, tpu.core_type = #tpu.core_type<tc>, window_params = [{pipeline_mode = #tpu.pipeline_mode<synchronous>, transform_indices = @transform_0, window_bounds = array<i64: 64, 64>}, {pipeline_mode = #tpu.pipeline_mode<synchronous>, transform_indices = @transform_1, window_bounds = array<i64: 64, 8>}, {pipeline_mode = #tpu.pipeline_mode<synchronous>, transform_indices = @transform_2, window_bounds = array<i64: 8, 32>}, {pipeline_mode = #tpu.pipeline_mode<synchronous>, transform_indices = @transform_3, window_bounds = array<i64: 8, 32>}, {pipeline_mode = #tpu.pipeline_mode<synchronous>, transform_indices = @transform_4, window_bounds = array<i64: 1, 32>}, {pipeline_mode = #tpu.pipeline_mode<synchronous>, transform_indices = @transform_5, window_bounds = array<i64: 32, 256>}, {pipeline_mode = #tpu.pipeline_mode<synchronous>, transform_indices = @transform_6, window_bounds = array<i64: 1, 128>}, {pipeline_mode = #tpu.pipeline_mode<synchronous>, transform_indices = @transform_7, window_bounds = array<i64: 64, 128>}]} {
    %c0 = arith.constant 0 : index
    %c0_0 = arith.constant 0 : index
    %0 = vector.load %arg1[%c0, %c0_0] : memref<64x64xf32, #tpu.memory_space<vmem>>, vector<64x64xf32>
    %c0_1 = arith.constant 0 : index
    %c0_2 = arith.constant 0 : index
    %1 = vector.load %arg2[%c0_1, %c0_2] : memref<64x8xf32, #tpu.memory_space<vmem>>, vector<64x8xf32>
    %c0_3 = arith.constant 0 : index
    %c0_4 = arith.constant 0 : index
    %2 = vector.load %arg3[%c0_3, %c0_4] : memref<8x32xf32, #tpu.memory_space<vmem>>, vector<8x32xf32>
    %cst = arith.constant dense<0.000000e+00> : vector<64x32xf32>
    %3 = tpu.matmul %1, %2, %cst {dimension_numbers = #tpu.dot_dimension_numbers<[1], [0], [0], [1], [0, 0, 1, 1], [], []>} : vector<64x8xf32>, vector<8x32xf32>, vector<64x32xf32> -> vector<64x32xf32>
    %c0_5 = arith.constant 0 : index
    %c0_6 = arith.constant 0 : index
    %4 = vector.load %arg4[%c0_5, %c0_6] : memref<8x32xf32, #tpu.memory_space<vmem>>, vector<8x32xf32>
    %cst_7 = arith.constant dense<0.000000e+00> : vector<64x32xf32>
    %5 = tpu.matmul %1, %4, %cst_7 {dimension_numbers = #tpu.dot_dimension_numbers<[1], [0], [0], [1], [0, 0, 1, 1], [], []>} : vector<64x8xf32>, vector<8x32xf32>, vector<64x32xf32> -> vector<64x32xf32>
    %cst_8 = arith.constant dense<0.000000e+00> : vector<64x32xf32>
    %6 = tpu.matmul %0, %3, %cst_8 {dimension_numbers = #tpu.dot_dimension_numbers<[1], [0], [0], [1], [0, 0, 1, 1], [], []>} : vector<64x64xf32>, vector<64x32xf32>, vector<64x32xf32> -> vector<64x32xf32>
    %7 = arith.addf %6, %5 : vector<64x32xf32>
    %c0_9 = arith.constant 0 : index
    %c0_10 = arith.constant 0 : index
    %8 = vector.load %arg5[%c0_9, %c0_10] : memref<1x32xf32, #tpu.memory_space<vmem>>, vector<1x32xf32>
    %9 = vector.broadcast %8 : vector<1x32xf32> to vector<64x32xf32>
    %10 = arith.addf %7, %9 : vector<64x32xf32>
    %11 = math.tanh %10 : vector<64x32xf32>
    %c0_11 = arith.constant 0 : index
    %c0_12 = arith.constant 0 : index
    %12 = vector.load %arg6[%c0_11, %c0_12] : memref<32x256xf32, #tpu.memory_space<vmem>>, vector<32x256xf32>
    %cst_13 = arith.constant dense<0.000000e+00> : vector<64x256xf32>
    %13 = tpu.matmul %11, %12, %cst_13 {dimension_numbers = #tpu.dot_dimension_numbers<[1], [0], [0], [1], [0, 0, 1, 1], [], []>} : vector<64x32xf32>, vector<32x256xf32>, vector<64x256xf32> -> vector<64x256xf32>
    %14 = vector.extract_strided_slice %13 {offsets = [0, 0], sizes = [64, 128], strides = [1, 1]} : vector<64x256xf32> to vector<64x128xf32>
    %15 = vector.extract_strided_slice %13 {offsets = [0, 128], sizes = [64, 128], strides = [1, 1]} : vector<64x256xf32> to vector<64x128xf32>
    %cst_14 = arith.constant dense<0.000000e+00> : vector<64x128xf32>
    %16 = tpu.matmul %0, %14, %cst_14 {dimension_numbers = #tpu.dot_dimension_numbers<[1], [0], [0], [1], [0, 0, 1, 1], [], []>} : vector<64x64xf32>, vector<64x128xf32>, vector<64x128xf32> -> vector<64x128xf32>
    %17 = arith.addf %16, %15 : vector<64x128xf32>
    %c0_15 = arith.constant 0 : index
    %c0_16 = arith.constant 0 : index
    %18 = vector.load %arg7[%c0_15, %c0_16] : memref<1x128xf32, #tpu.memory_space<vmem>>, vector<1x128xf32>
    %19 = vector.broadcast %18 : vector<1x128xf32> to vector<64x128xf32>
    %20 = arith.addf %17, %19 : vector<64x128xf32>
    %c0_17 = arith.constant 0 : index
    %c0_18 = arith.constant 0 : index
    %21 = vector.load %arg8[%c0_17, %c0_18] : memref<64x128xf32, #tpu.memory_space<vmem>>, vector<64x128xf32>
    tpu.vector_store %arg8[%c0_17, %c0_18], %20 {strides = array<i32>} : memref<64x128xf32, #tpu.memory_space<vmem>>, vector<64x128xf32>,
    return
  }
  func.func @transform_0(%arg0: i32) -> (i32, i32) {
    %c0_i32 = arith.constant 0 : i32
    %c0_i32_0 = arith.constant 0 : i32
    %c0_i32_1 = arith.constant 0 : i32
    return %c0_i32, %c0_i32_0 : i32, i32
  }
  func.func @transform_1(%arg0: i32) -> (i32, i32) {
    %c0_i32 = arith.constant 0 : i32
    %c0_i32_0 = arith.constant 0 : i32
    %c0_i32_1 = arith.constant 0 : i32
    return %c0_i32, %c0_i32_0 : i32, i32
  }
  func.func @transform_2(%arg0: i32) -> (i32, i32) {
    %c0_i32 = arith.constant 0 : i32
    %c0_i32_0 = arith.constant 0 : i32
    %c0_i32_1 = arith.constant 0 : i32
    return %c0_i32, %c0_i32_0 : i32, i32
  }
  func.func @transform_3(%arg0: i32) -> (i32, i32) {
    %c0_i32 = arith.constant 0 : i32
    %c0_i32_0 = arith.constant 0 : i32
    %c0_i32_1 = arith.constant 0 : i32
    return %c0_i32, %c0_i32_0 : i32, i32
  }
  func.func @transform_4(%arg0: i32) -> (i32, i32) {
    %c0_i32 = arith.constant 0 : i32
    %c0_i32_0 = arith.constant 0 : i32
    %c0_i32_1 = arith.constant 0 : i32
    return %c0_i32, %c0_i32_0 : i32, i32
  }
  func.func @transform_5(%arg0: i32) -> (i32, i32) {
    %c0_i32 = arith.constant 0 : i32
    %c0_i32_0 = arith.constant 0 : i32
    %c0_i32_1 = arith.constant 0 : i32
    return %c0_i32, %c0_i32_0 : i32, i32
  }
  func.func @transform_6(%arg0: i32) -> (i32, i32) {
    %c0_i32 = arith.constant 0 : i32
    %c0_i32_0 = arith.constant 0 : i32
    %c0_i32_1 = arith.constant 0 : i32
    return %c0_i32, %c0_i32_0 : i32, i32
  }
  func.func @transform_7(%arg0: i32) -> (i32, i32) {
    %c0_i32 = arith.constant 0 : i32
    %c0_i32_0 = arith.constant 0 : i32
    %c0_i32_1 = arith.constant 0 : i32
    return %c0_i32, %c0_i32_0 : i32, i32
  }
}

</mosaic_0001>

<bundles_post_ra>
// kernel: sparse_gnn_forward.1
= control target key start
LH: loop header
LB: loop body
LE: loop exit
PB: predicated region body
PF: predicated region fallthrough
CT: control target
= control target key end

     0   :  { %12 = vsyncpa [#allocation3], 0  ;;  %s784_s0 = inlined_call_operand.vmem [shape: f32[64,64], index: 0, kind: input, shape index: {}]   ;;  %s785_s1 = inlined_call_operand.vmem [shape: f32[64,8], index: 1, kind: input, shape index: {}]   ;;  %s786_s2 = inlined_call_operand.vmem [shape: f32[8,32], index: 2, kind: input, shape index: {}]   ;;  %s787_s3 = inlined_call_operand.hbm [shape: f32[8,32], index: 3, kind: input, shape index: {}]   ;;  %s788_s4 = inlined_call_operand.vmem [shape: f32[1,32], index: 4, kind: input, shape index: {}]   ;;  %s789_s5 = inlined_call_operand.hbm [shape: f32[32,256], index: 5, kind: input, shape index: {}]   ;;  %s790_s6 = inlined_call_operand.vmem [shape: f32[1,128], index: 6, kind: input, shape index: {}]   ;;  %s791_s7 = inlined_call_operand.vmem [shape: f32[64,128], index: 7, kind: output, shape index: {}]  }
   0x1   :  { %s25_s26 = sshll.u32 %s787_s3, 4  ;;  %s26_s26 = int_to_ptr.hbm [resolvable:$true] %s25_s26 }
   0x2   :  { %13 = vsyncpa [#allocation5], 0  ;;  %s573_s27 = smov [#allocation2]   ;;  %s37_s8 = sshll.u32 %s789_s5, 4  ;;  %s38_s8 = int_to_ptr.hbm [resolvable:$true] %s37_s8 }
   0x3   :  { %s27_s28 = sshll.u32 %s573_s27, 4  ;;  %s574_s9 = smov [#allocation4]   ;;  %s28_s28 = int_to_ptr.vmem [resolvable:$true] %s27_s28 }
   0x4   :  { %30 = dma.hbm_to_vmem [thread:$0]  %s26_s26, 128, %s28_s28, [#allocation3]  }
   0x5   :  { %s39_s10 = sshll.u32 %s574_s9, 4  ;;  %s575_s11 = smov 256   ;;  %s40_s10 = int_to_ptr.vmem [resolvable:$true] %s39_s10 }
   0x6   :  { %s576_s12 = smov 16  }
   0x7   :  { %45 = dma.hbm_to_vmem [thread:$0]  %s38_s8, 1024, %s40_s10, [#allocation5], %s575_s11, %s575_s11, %s576_s12  }
   0x8   :  { %569 = dma.done.wait [#allocation3], 128  }
   0x9   :  { %570 = vsyncadd [#allocation3], 4294967168 }
   0xa   :  { %571 = dma.done.wait [#allocation5], 1024  }
   0xb   :  { %572 = vsyncadd [#allocation5], 4294966272  ;;  %vm73_vm0 = vcmask 64512   ;;  %v72_v0 = vld [vmem:[%s786_s2] sm:$0xff]  ;;  %v69_v3 = vld [vmem:[%s785_s1 + $0x28] sm:$0xff]  ;;  %vm181_vm1 = vcmask 523264  }
   0xc   :  { %v68_v1 = vld [vmem:[%s785_s1 + $0x20] sm:$0xff]  ;;  %497 = vmatpush.msra.mxu3 %v72_v0  ;;  %113 = vmatpush.msra.mxu0 %v72_v0  ;;  %v65_v4 = vld [vmem:[%s785_s1 + $0x8] sm:$0xff]  ;;  %v70_v5 = vld [vmem:[%s785_s1 + $0x30] sm:$0xff]  ;;  %vm275_vm2 = vcmask 261120  }
   0xd   :  { %v64_v2 = vld [vmem:[%s785_s1] sm:$0xff]  ;;  %453 = vmatmul.msk.f32.vlgmr.msra.gmra.mxu3 %vm73_vm0, %v68_v1  ;;  %v66_v6 = vld [vmem:[%s785_s1 + $0x10] sm:$0xff]  ;;  %v71_v7 = vld [vmem:[%s785_s1 + $0x38] sm:$0xff] }
   0xe   :  { %449 = vmatmul.msk.f32.vlgmr.msra.gmra.mxu0 %vm73_vm0, %v64_v2  ;;  %v67_v8 = vld [vmem:[%s785_s1 + $0x18] sm:$0xff]  ;;  %v139_v9 = vld [vmem:[#allocation2] sm:$0xff]  ;;  %v676_v19 = vld [vmem:[%s784_s0 + $0x8] sm:$0xff] }
   0xf   :  { %498 = vmatpush.msra.mxu2 %v139_v9  ;;  %155 = vmatpush.msra.mxu1 %v139_v9  ;;  %v669_v18 = vld [vmem:[%s784_s0] sm:$0xff]  ;;  %v683_v20 = vld [vmem:[%s784_s0 + $0x10] sm:$0xff]  ;;  %v690_v21 = vld [vmem:[%s784_s0 + $0x18] sm:$0xff] }
  0x10   :  { %461 = vmatmul.msk.f32.vlgmr.msra.gmra.mxu2 %vm73_vm0, %v68_v1  ;;  %457 = vmatmul.msk.f32.vlgmr.msra.gmra.mxu1 %vm73_vm0, %v64_v2  ;;  %v697_v22 = vld [vmem:[%s784_s0 + $0x20] sm:$0xff]  ;;  %v704_v23 = vld [vmem:[%s784_s0 + $0x28] sm:$0xff]  ;;  %v711_v24 = vld [vmem:[%s784_s0 + $0x30] sm:$0xff] }
  0x11   :  { %v718_v25 = vld [vmem:[%s784_s0 + $0x38] sm:$0xff]  ;;  %v274_v29 = vld [vmem:[#allocation4 + $0x38] sm:$0xff]  ;;  %v271_v30 = vld [vmem:[#allocation4 + $0x20] sm:$0xff] }
  0x12   :  { %v273_v26 = vld [vmem:[#allocation4 + $0x30] sm:$0xff]  ;;  %353 = vmatpush.msrb.mxu0 %v274_v29  ;;  %v272_v31 = vld [vmem:[#allocation4 + $0x28] sm:$0xff]  ;;  %v270_v33 = vld [vmem:[#allocation4 + $0x18] sm:$0xff] }
  0x13   :  { %312 = vmatpush.msrb.mxu3 %v273_v26  ;;  %v269_v32 = vld [vmem:[#allocation4 + $0x10] sm:$0xff]  ;;  %v267_v34 = vld [vmem:[#allocation4] sm:$0xff]  ;;  %v268_v35 = vld [vmem:[#allocation4 + $0x8] sm:$0xff] }
  0x14   :  { %354 = vmatpush.msrb.mxu0 %v272_v31  ;;  %v503_v39 = vld [vmem:[%s788_s4] ss:$0 sm:$0xff] }
  0x15   :  { %454 = vmatmul.msk.f32.gmra.mxu3 %vm73_vm0, %v69_v3 }
  0x16   :  { %450 = vmatmul.msk.f32.gmra.mxu0 %vm73_vm0, %v65_v4  ;;  %313 = vmatpush.msrb.mxu3 %v271_v30 }
  0x17   :  { %355 = vmatpush.msrb.mxu0 %v270_v33 }
  0x18   :  { %462 = vmatmul.msk.f32.gmra.mxu2 %vm73_vm0, %v69_v3  ;;  %458 = vmatmul.msk.f32.gmra.mxu1 %vm73_vm0, %v65_v4 }
  0x19   :  { %314 = vmatpush.msrb.mxu3 %v269_v32  ;;  %356 = vmatpush.msrb.mxu0 %v268_v35 }
  0x1b   :  { %315 = vmatpush.msrb.mxu3 %v267_v34 }
  0x1d   :  { %455 = vmatmul.msk.f32.gmra.mxu3 %vm73_vm0, %v70_v5 }
  0x1e   :  { %451 = vmatmul.msk.f32.gmra.mxu0 %vm73_vm0, %v66_v6 }
  0x20   :  { %463 = vmatmul.msk.f32.gmra.mxu2 %vm73_vm0, %v70_v5  ;;  %459 = vmatmul.msk.f32.gmra.mxu1 %vm73_vm0, %v66_v6 }
  0x25   :  { %456 = vmatmul.msk.f32.gmra.mxu3 %vm73_vm0, %v71_v7 }
  0x26   :  { %452 = vmatmul.msk.f32.gmra.mxu0 %vm73_vm0, %v67_v8 }
  0x28   :  { %464 = vmatmul.msk.f32.gmra.mxu2 %vm73_vm0, %v71_v7  ;;  %460 = vmatmul.msk.f32.gmra.mxu1 %vm73_vm0, %v67_v8 }
  0x8b   :  { %v115_v11 = vpop.f32.mrf.mxu0 }
  0x8d   :  { %v157_v38 = vpop.f32.mrf.mxu1 }
  0x90   :  { %v127_v10 = vpop.f32.mrf.mxu3 }
  0x93   :  { %v118_v13 = vpop.f32.mrf.mxu0  ;;  %v169_v27 = vpop.f32.mrf.mxu2 }
  0x95   :  { %v160_v42 = vpop.f32.mrf.mxu1 }
  0x98   :  { %v130_v12 = vpop.f32.mrf.mxu3 }
  0x9b   :  { %v121_v15 = vpop.f32.mrf.mxu0  ;;  %v172_v28 = vpop.f32.mrf.mxu2 }
  0x9d   :  { %v163_v48 = vpop.f32.mrf.mxu1 }
  0xa0   :  { %v133_v14 = vpop.f32.mrf.mxu3 }
  0xa3   :  { %v124_v17 = vpop.f32.mrf.mxu0  ;;  %v175_v36 = vpop.f32.mrf.mxu2 }
  0xa5   :  { %v166_v53 = vpop.f32.mrf.mxu1 }
  0xa8   :  { %v136_v16 = vpop.f32.mrf.mxu3 }
  0xa9   :  { %214 = vmatpush.msrb.mxu2 %v136_v16 }
  0xab   :  { %215 = vmatpush.msrb.mxu2 %v133_v14  ;;  %v178_v37 = vpop.f32.mrf.mxu2 }
  0xad   :  { %216 = vmatpush.msrb.mxu2 %v130_v12 }
  0xaf   :  { %217 = vmatpush.msrb.mxu2 %v127_v10 }
  0xb1   :  { %218 = vmatpush.msrb.mxu2 %v124_v17 }
  0xb3   :  { %219 = vmatpush.msrb.mxu2 %v121_v15 }
  0xb5   :  { %220 = vmatpush.msrb.mxu2 %v118_v13 }
  0xb7   :  { %221 = vmatpush.msrb.mxu2 %v115_v11 }
  0xb8   :  { %465 = vmatmul.msk.f32.vlgmr.msrb.gmra.mxu2 %vm181_vm1, %v669_v18 }
  0xc0   :  { %466 = vmatmul.msk.f32.gmra.mxu2 %vm181_vm1, %v676_v19 }
  0xc8   :  { %467 = vmatmul.msk.f32.gmra.mxu2 %vm181_vm1, %v683_v20 }
  0xd0   :  { %468 = vmatmul.msk.f32.gmra.mxu2 %vm181_vm1, %v690_v21 }
  0xd8   :  { %469 = vmatmul.msk.f32.gmra.mxu2 %vm181_vm1, %v697_v22 }
  0xe0   :  { %470 = vmatmul.msk.f32.gmra.mxu2 %vm181_vm1, %v704_v23 }
  0xe8   :  { %471 = vmatmul.msk.f32.gmra.mxu2 %vm181_vm1, %v711_v24 }
  0xf0   :  { %472 = vmatmul.msk.f32.gmra.mxu2 %vm181_vm1, %v718_v25 }
 0x13b   :  { %v223_v40 = vpop.f32.mrf.mxu2 }
 0x13c   :  { %v224_v41 = vadd.f32 %v223_v40, %v157_v38 }
 0x13e   :  { %v251_v43 = vadd.f32 %v503_v39, %v224_v41 }
 0x140   :  { %505 = vtanh.f32 %v251_v43 }
 0x143   :  { %v226_v44 = vpop.f32.mrf.mxu2 }
 0x144   :  { %v227_v45 = vadd.f32 %v226_v44, %v160_v42 }
 0x146   :  { %v506_v46 = vpop.eup %505  ;;  %v252_v47 = vadd.f32 %v503_v39, %v227_v45 }
 0x147   :  { %473 = vmatmul.msk.f32.vlgmr.msrb.gmra.mxu3 %vm275_vm2, %v506_v46  ;;  %481 = vmatmul.msk.f32.vlgmr.msrb.gmra.mxu0 %vm275_vm2, %v506_v46 }
 0x148   :  { %507 = vtanh.f32 %v252_v47 }
 0x14b   :  { %v229_v49 = vpop.f32.mrf.mxu2 }
 0x14c   :  { %v230_v50 = vadd.f32 %v229_v49, %v163_v48 }
 0x14e   :  { %v508_v51 = vpop.eup %507  ;;  %v253_v52 = vadd.f32 %v503_v39, %v230_v50 }
 0x14f   :  { %474 = vmatmul.msk.f32.gmra.mxu3 %vm275_vm2, %v508_v51  ;;  %482 = vmatmul.msk.f32.gmra.mxu0 %vm275_vm2, %v508_v51 }
 0x150   :  { %509 = vtanh.f32 %v253_v52 }
 0x153   :  { %v232_v54 = vpop.f32.mrf.mxu2 }
 0x154   :  { %v233_v55 = vadd.f32 %v232_v54, %v166_v53 }
 0x156   :  { %v510_v56 = vpop.eup %509  ;;  %v254_v57 = vadd.f32 %v503_v39, %v233_v55 }
 0x157   :  { %475 = vmatmul.msk.f32.gmra.mxu3 %vm275_vm2, %v510_v56  ;;  %483 = vmatmul.msk.f32.gmra.mxu0 %vm275_vm2, %v510_v56 }
 0x158   :  { %511 = vtanh.f32 %v254_v57 }
 0x15b   :  { %v235_v58 = vpop.f32.mrf.mxu2 }
 0x15c   :  { %v236_v59 = vadd.f32 %v235_v58, %v169_v27 }
 0x15e   :  { %v512_v60 = vpop.eup %511  ;;  %v255_v61 = vadd.f32 %v503_v39, %v236_v59 }
 0x15f   :  { %476 = vmatmul.msk.f32.gmra.mxu3 %vm275_vm2, %v512_v60  ;;  %484 = vmatmul.msk.f32.gmra.mxu0 %vm275_vm2, %v512_v60 }
 0x160   :  { %513 = vtanh.f32 %v255_v61 }
 0x163   :  { %v238_v62 = vpop.f32.mrf.mxu2 }
 0x164   :  { %v239_v63 = vadd.f32 %v238_v62, %v172_v28 }
 0x166   :  { %v514_v0 = vpop.eup %513  ;;  %v256_v1 = vadd.f32 %v503_v39, %v239_v63 }
 0x167   :  { %477 = vmatmul.msk.f32.gmra.mxu3 %vm275_vm2, %v514_v0  ;;  %485 = vmatmul.msk.f32.gmra.mxu0 %vm275_vm2, %v514_v0 }
 0x168   :  { %515 = vtanh.f32 %v256_v1 }
 0x16b   :  { %v241_v2 = vpop.f32.mrf.mxu2 }
 0x16c   :  { %v242_v3 = vadd.f32 %v241_v2, %v175_v36 }
 0x16e   :  { %v516_v4 = vpop.eup %515  ;;  %v257_v5 = vadd.f32 %v503_v39, %v242_v3 }
 0x16f   :  { %478 = vmatmul.msk.f32.gmra.mxu3 %vm275_vm2, %v516_v4  ;;  %486 = vmatmul.msk.f32.gmra.mxu0 %vm275_vm2, %v516_v4 }
 0x170   :  { %517 = vtanh.f32 %v257_v5 }
 0x173   :  { %v244_v6 = vpop.f32.mrf.mxu2 }
 0x174   :  { %v245_v7 = vadd.f32 %v244_v6, %v178_v37 }
 0x176   :  { %v518_v8 = vpop.eup %517  ;;  %v258_v9 = vadd.f32 %v503_v39, %v245_v7 }
 0x177   :  { %479 = vmatmul.msk.f32.gmra.mxu3 %vm275_vm2, %v518_v8  ;;  %487 = vmatmul.msk.f32.gmra.mxu0 %vm275_vm2, %v518_v8 }
 0x178   :  { %519 = vtanh.f32 %v258_v9 }
 0x17e   :  { %v520_v10 = vpop.eup %519 }
 0x17f   :  { %480 = vmatmul.msk.f32.gmra.mxu3 %vm275_vm2, %v520_v10  ;;  %488 = vmatmul.msk.f32.gmra.mxu0 %vm275_vm2, %v520_v10 }
 0x1ca   :  { %v317_v11 = vpop.f32.mrf.mxu3 }
 0x1d2   :  { %v320_v12 = vpop.f32.mrf.mxu3 }
 0x1da   :  { %v323_v13 = vpop.f32.mrf.mxu3 }
 0x1e2   :  { %v326_v14 = vpop.f32.mrf.mxu3 }
 0x1ea   :  { %v329_v15 = vpop.f32.mrf.mxu3 }
 0x1f2   :  { %v332_v16 = vpop.f32.mrf.mxu3 }
 0x1fa   :  { %v335_v17 = vpop.f32.mrf.mxu3 }
 0x202   :  { %v338_v26 = vpop.f32.mrf.mxu3 }
 0x203   :  { %390 = vmatpush.msrb.mxu1 %v338_v26 }
 0x205   :  { %391 = vmatpush.msrb.mxu1 %v335_v17 }
 0x207   :  { %392 = vmatpush.msrb.mxu1 %v332_v16 }
 0x209   :  { %393 = vmatpush.msrb.mxu1 %v329_v15 }
 0x20b   :  { %394 = vmatpush.msrb.mxu1 %v326_v14 }
 0x20d   :  { %395 = vmatpush.msrb.mxu1 %v323_v13 }
 0x20f   :  { %396 = vmatpush.msrb.mxu1 %v320_v12 }
 0x211   :  { %397 = vmatpush.msrb.mxu1 %v317_v11 }
 0x212   :  { %489 = vmatmul.msk.f32.vlgmr.msrb.gmra.mxu1 %vm181_vm1, %v669_v18  ;;  %v358_v18 = vpop.f32.mrf.mxu0 }
 0x21a   :  { %490 = vmatmul.msk.f32.gmra.mxu1 %vm181_vm1, %v676_v19  ;;  %v361_v19 = vpop.f32.mrf.mxu0 }
 0x222   :  { %491 = vmatmul.msk.f32.gmra.mxu1 %vm181_vm1, %v683_v20  ;;  %v504_v20 = vld [vmem:[%s790_s6] ss:$0 sm:$0xff] }
 0x22a   :  { %492 = vmatmul.msk.f32.gmra.mxu1 %vm181_vm1, %v690_v21 }
 0x232   :  { %493 = vmatmul.msk.f32.gmra.mxu1 %vm181_vm1, %v697_v22  ;;  %v364_v22 = vpop.f32.mrf.mxu0 }
 0x23a   :  { %494 = vmatmul.msk.f32.gmra.mxu1 %vm181_vm1, %v704_v23 }
 0x242   :  { %495 = vmatmul.msk.f32.gmra.mxu1 %vm181_vm1, %v711_v24 }
 0x24a   :  { %496 = vmatmul.msk.f32.gmra.mxu1 %vm181_vm1, %v718_v25  ;;  %v367_v25 = vpop.f32.mrf.mxu0 }
 0x252   :  { %v370_v35 = vpop.f32.mrf.mxu0 }
 0x25a   :  { %v373_v40 = vpop.f32.mrf.mxu0 }
 0x262   :  { %v376_v44 = vpop.f32.mrf.mxu0 }
 0x26a   :  { %v379_v48 = vpop.f32.mrf.mxu0 }
 0x28f   :  { %v399_v27 = vpop.f32.mrf.mxu1 }
 0x290   :  { %v400_v21 = vadd.f32 %v399_v27, %v358_v18 }
 0x292   :  { %v427_v28 = vadd.f32 %v504_v20, %v400_v21 }
 0x294   :  { %435 = vst [vmem:[%s791_s7] sm:$0xff] %v427_v28 }
 0x297   :  { %v402_v23 = vpop.f32.mrf.mxu1 }
 0x298   :  { %v403_v29 = vadd.f32 %v402_v23, %v361_v19 }
 0x29a   :  { %v428_v24 = vadd.f32 %v504_v20, %v403_v29 }
 0x29c   :  { %436 = vst [vmem:[%s791_s7 + $0x8] sm:$0xff] %v428_v24 }
 0x29f   :  { %v405_v30 = vpop.f32.mrf.mxu1 }
 0x2a0   :  { %v406_v31 = vadd.f32 %v405_v30, %v364_v22 }
 0x2a2   :  { %v429_v32 = vadd.f32 %v504_v20, %v406_v31 }
 0x2a4   :  { %437 = vst [vmem:[%s791_s7 + $0x10] sm:$0xff] %v429_v32 }
 0x2a7   :  { %v408_v33 = vpop.f32.mrf.mxu1 }
 0x2a8   :  { %v409_v34 = vadd.f32 %v408_v33, %v367_v25 }
 0x2aa   :  { %v430_v36 = vadd.f32 %v504_v20, %v409_v34 }
 0x2ac   :  { %438 = vst [vmem:[%s791_s7 + $0x18] sm:$0xff] %v430_v36 }
 0x2af   :  { %v411_v37 = vpop.f32.mrf.mxu1 }
 0x2b0   :  { %v412_v38 = vadd.f32 %v411_v37, %v370_v35 }
 0x2b2   :  { %v431_v39 = vadd.f32 %v504_v20, %v412_v38 }
 0x2b4   :  { %439 = vst [vmem:[%s791_s7 + $0x20] sm:$0xff] %v431_v39 }
 0x2b7   :  { %v414_v41 = vpop.f32.mrf.mxu1 }
 0x2b8   :  { %v415_v42 = vadd.f32 %v414_v41, %v373_v40 }
 0x2ba   :  { %v432_v43 = vadd.f32 %v504_v20, %v415_v42 }
 0x2bc   :  { %440 = vst [vmem:[%s791_s7 + $0x28] sm:$0xff] %v432_v43 }
 0x2bf   :  { %v417_v45 = vpop.f32.mrf.mxu1 }
 0x2c0   :  { %v418_v46 = vadd.f32 %v417_v45, %v376_v44 }
 0x2c2   :  { %v433_v47 = vadd.f32 %v504_v20, %v418_v46 }
 0x2c4   :  { %441 = vst [vmem:[%s791_s7 + $0x30] sm:$0xff] %v433_v47 }
 0x2c7   :  { %v420_v49 = vpop.f32.mrf.mxu1 }
 0x2c8   :  { %v421_v50 = vadd.f32 %v420_v49, %v379_v48 }
 0x2ca   :  { %v434_v51 = vadd.f32 %v504_v20, %v421_v50 }
 0x2cc   :  { %442 = vst [vmem:[%s791_s7 + $0x38] sm:$0xff] %v434_v51 }
 0x2cd   :  { %447 = vsyncpa [#allocation3], 1 }
 0x2ce   :  { %448 = vsyncpa [#allocation5], 1 }

</bundles_post_ra>
